<compile_context>
chip_gen: v7x
topology: tpu7x:2x2x1
jax: 0.10.0
libtpu: 0.0.40
codegen_flags: <defaults>
</compile_context>

<pallas_src>
import functools

import jax
import jax.numpy as jnp
from jax.experimental import pallas as pl
from jax.experimental.pallas import tpu as pltpu


_MAX_COLLAPSE_F = 8192      # collapse the K axis (tk = F) up to this many features
_DEFAULT_TK = 512           # K tile for the (rare) large-F split path


def _round_up(v, m):
    return ((v + m - 1) // m) * m


def _vmem_budget():
    """(tile budget bytes, physical VMEM bytes). Capped so v6e configs fit v7x."""
    try:
        cap = int(pltpu.get_tpu_info().vmem_capacity_bytes)
    except Exception:
        cap = 64 << 20
    budget = min(int(cap * 0.7), 48 << 20)
    return budget, cap


def _pick_tm(B, sub, cap):
    """Pick a batch tile. Returns (tm, padded_B). Avoids padding x when possible."""
    cap = max(sub, (cap // sub) * sub)
    if B <= cap:
        # Full-extent (or half-extent) block -> no padding needed.
        if B >= 256 and B % (2 * sub) == 0 and (B // 2) <= cap:
            return B // 2, B          # >=2 batch tiles so the 2nd TC gets work
        return B, B
    # Multiple tiles: prefer a tile that divides B exactly (no x padding).
    for t in range(cap, sub - 1, -sub):
        if B % t == 0:
            if t >= 64:
                return t, B
            break
    return cap, _round_up(B, cap)


def _pick_tn(Op):
    tn = min(Op, 256)
    while Op % tn:            # Op is always a multiple of 128, so this terminates
        tn -= 128
    return tn


# --------------------------------------------------------------------------
# Kernels
# --------------------------------------------------------------------------

def _linear_kernel_collapsed(x_ref, wt_ref, b_ref, o_ref, *, compute_dtype):
    # x_ref: [tm, F]  wt_ref: [F, tn]  b_ref: [1, tn]  o_ref: [tm, tn]
    x = x_ref[...]
    w = wt_ref[...]
    if compute_dtype is not None:
        x = x.astype(compute_dtype)
        w = w.astype(compute_dtype)
    acc = jnp.dot(x, w, preferred_element_type=jnp.float32)
    o_ref[...] = (acc + b_ref[...].astype(jnp.float32)).astype(o_ref.dtype)


def _linear_kernel_kpath_f32(x_ref, wt_ref, b_ref, o_ref, *, compute_dtype):
    # f32 output: accumulate directly into the (k-resident) output block.
    k = pl.program_id(2)

    @pl.when(k == 0)
    def _init():
        o_ref[...] = jnp.broadcast_to(b_ref[...], o_ref.shape).astype(o_ref.dtype)

    x = x_ref[...]
    w = wt_ref[...]
    if compute_dtype is not None:
        x = x.astype(compute_dtype)
        w = w.astype(compute_dtype)
    o_ref[...] += jnp.dot(x, w, preferred_element_type=jnp.float32)


def _linear_kernel_kpath_acc(x_ref, wt_ref, b_ref, o_ref, acc_ref, *, compute_dtype):
    # Non-f32 output: keep an f32 VMEM accumulator, finalize on the last K step.
    k = pl.program_id(2)

    @pl.when(k == 0)
    def _init():
        acc_ref[...] = jnp.zeros_like(acc_ref)

    x = x_ref[...]
    w = wt_ref[...]
    if compute_dtype is not None:
        x = x.astype(compute_dtype)
        w = w.astype(compute_dtype)
    acc_ref[...] += jnp.dot(x, w, preferred_element_type=jnp.float32)

    @pl.when(k == pl.num_programs(2) - 1)
    def _finalize():
        o_ref[...] = (acc_ref[...] + b_ref[...].astype(jnp.float32)).astype(o_ref.dtype)


# --------------------------------------------------------------------------
# pallas_call wrappers
# --------------------------------------------------------------------------

def _pallas_linear_collapsed(x, wt, b2, *, out_dtype, compute_dtype, budget, vmem_limit):
    B, F = x.shape
    Fw, Op = wt.shape
    assert Fw == F, (Fw, F)
    in_b = x.dtype.itemsize
    w_b = wt.dtype.itemsize
    out_b = jnp.dtype(out_dtype).itemsize
    sub = 16 if (x.dtype == jnp.bfloat16 or compute_dtype == jnp.bfloat16) else 8

    tn = _pick_tn(Op)
    J = Op // tn

    # VMEM budget (inputs are double-buffered by the pipeline) -> batch tile.
    fixed = 2 * F * tn * w_b + 2 * tn * 4                 # weight + bias buffers
    per_row = 2 * F * in_b + 2 * tn * out_b               # x + out buffers per row
    tm_cap = int(min(max(sub, (budget - fixed) // per_row), 1024))
    tm, Bp = _pick_tm(B, sub, tm_cap)
    if Bp != B:
        x = jnp.pad(x, ((0, Bp - B), (0, 0)))
    I = Bp // tm

    # Grid ordering: a block whose index_map ignores the INNER grid axis stays
    # resident in VMEM across that whole inner loop.  Keep the weight resident
    # across batch tiles unless re-streaming x J times is cheaper.
    weight_resident = (J - 1) * Bp * in_b <= (I - 1) * Op * w_b
    if weight_resident:
        grid = (J, I)
        x_map = lambda j, i: (i, 0)
        w_map = lambda j, i: (0, j)
        b_map = lambda j, i: (0, j)
        o_map = lambda j, i: (i, j)
    else:
        grid = (I, J)
        x_map = lambda i, j: (i, 0)
        w_map = lambda i, j: (0, j)
        b_map = lambda i, j: (0, j)
        o_map = lambda i, j: (i, j)

    kernel = functools.partial(_linear_kernel_collapsed, compute_dtype=compute_dtype)
    out = pl.pallas_call(
        kernel,
        out_shape=jax.ShapeDtypeStruct((Bp, Op), out_dtype),
        grid_spec=pltpu.PrefetchScalarGridSpec(
            num_scalar_prefetch=0,
            grid=grid,
            in_specs=[
                pl.BlockSpec((tm, F), x_map),
                pl.BlockSpec((F, tn), w_map),
                pl.BlockSpec((1, tn), b_map),
            ],
            out_specs=pl.BlockSpec((tm, tn), o_map),
        ),
        compiler_params=pltpu.CompilerParams(
            dimension_semantics=("parallel", "parallel"),
            vmem_limit_bytes=vmem_limit,
        ),
        cost_estimate=pl.CostEstimate(
            flops=2 * Bp * F * Op,
            transcendentals=0,
            bytes_accessed=Bp * F * in_b + F * Op * w_b + Bp * Op * out_b,
        ),
    )(x, wt, b2)
    if Bp != B:
        out = out[:B]
    return out


def _pallas_linear_kpath(x, wt, b2, *, out_dtype, compute_dtype, tk, budget, vmem_limit):
    B, F = x.shape
    Fp, Op = wt.shape
    if tk is None:  # largest standard K tile dividing the (hoisted) padded F
        tk = next(t for t in (1024, 512, 256, 128) if Fp % t == 0)
    assert Fp % tk == 0, (Fp, tk)

    in_b = x.dtype.itemsize
    w_b = wt.dtype.itemsize
    out_b = jnp.dtype(out_dtype).itemsize
    sub = 16 if (x.dtype == jnp.bfloat16 or compute_dtype == jnp.bfloat16) else 8

    tn = _pick_tn(Op)
    J = Op // tn
    K = Fp // tk
    use_scratch = jnp.dtype(out_dtype) != jnp.dtype(jnp.float32)

    fixed = 2 * tk * tn * w_b + 2 * tn * 4
    per_row = 2 * tk * in_b + 2 * tn * out_b + (tn * 4 if use_scratch else 0)
    tm_cap = int(min(max(sub, (budget - fixed) // per_row), 1024))
    tm, Bp = _pick_tm(B, sub, tm_cap)
    if (Bp, Fp) != (B, F):
        x = jnp.pad(x, ((0, Bp - B), (0, Fp - F)))   # K-pad rows contribute 0
    I = Bp // tm

    if use_scratch:
        kernel = functools.partial(_linear_kernel_kpath_acc, compute_dtype=compute_dtype)
        scratch = [pltpu.VMEM((tm, tn), jnp.float32)]
    else:
        kernel = functools.partial(_linear_kernel_kpath_f32, compute_dtype=compute_dtype)
        scratch = []

    out = pl.pallas_call(
        kernel,
        out_shape=jax.ShapeDtypeStruct((Bp, Op), out_dtype),
        grid_spec=pltpu.PrefetchScalarGridSpec(
            num_scalar_prefetch=0,
            grid=(I, J, K),
            in_specs=[
                pl.BlockSpec((tm, tk), lambda i, j, k: (i, k)),
                pl.BlockSpec((tk, tn), lambda i, j, k: (k, j)),
                pl.BlockSpec((1, tn), lambda i, j, k: (0, j)),
            ],
            out_specs=pl.BlockSpec((tm, tn), lambda i, j, k: (i, j)),
            scratch_shapes=scratch,
        ),
        compiler_params=pltpu.CompilerParams(
            dimension_semantics=("parallel", "parallel", "arbitrary"),
            vmem_limit_bytes=vmem_limit,
        ),
        cost_estimate=pl.CostEstimate(
            flops=2 * Bp * Fp * Op,
            transcendentals=0,
            bytes_accessed=Bp * Fp * in_b + I * Fp * Op * w_b + Bp * Op * out_b,
        ),
    )(x, wt, b2)
    if Bp != B:
        out = out[:B]
    return out


# --------------------------------------------------------------------------
# Public API
# --------------------------------------------------------------------------

def init_params(key, n_in_feat, n_out):
    """Matches torch: xavier_uniform_ on weight [n_out, n_in], bias = 0."""
    bound = jnp.sqrt(6.0 / (n_in_feat + n_out))
    weight = jax.random.uniform(
        key, (n_out, n_in_feat), minval=-bound, maxval=bound, dtype=jnp.float32
    )
    bias = jnp.zeros((n_out,), dtype=jnp.float32)
    return weight, bias


def prepare_params(weight, bias, *, compute_dtype=None,
                   max_collapse_features=_MAX_COLLAPSE_F, tk=_DEFAULT_TK):
    """One-time (hoisted) weight prep: transpose, lane-pad O, K-pad (only if the
    K-split path will be used) and optional bf16 cast.  Done once, not per call."""
    wt = jnp.asarray(weight).T                       # [F, O]
    F, O = wt.shape
    Op = _round_up(O, 128)                           # lane-dense output stores
    Fp = F if F <= max_collapse_features else _round_up(F, tk)
    if (Fp, Op) != (F, O):
        wt = jnp.pad(wt, ((0, Fp - F), (0, Op - O)))
    if compute_dtype is not None:
        wt = wt.astype(compute_dtype)
    b2 = jnp.pad(jnp.asarray(bias, dtype=jnp.float32), (0, Op - O)).reshape(1, Op)
    return wt, b2


def softmax_model_forward(x, wt, b2, *, n_out=None, compute_dtype=None,
                          force_pallas=False, min_flops_for_pallas=1 << 22,
                          max_collapse_features=_MAX_COLLAPSE_F, tk=None):
    """Forward of Softmax_Model: y = x @ W.T + b (W pre-transposed/padded in wt)."""
    B, F = x.shape
    Fp, Op = wt.shape
    if n_out is None:
        n_out = Op
    out_dtype = x.dtype

    # Tiny problems: launch/grid overhead dominates -> let XLA fuse dot+bias.
    if not force_pallas and (2 * B * F * n_out) < min_flops_for_pallas:
        y = jnp.dot(x, wt[:F, :]) + b2
        return y[:, :n_out].astype(out_dtype)

    budget, cap = _vmem_budget()
    vmem_limit = int(min(cap, budget + (16 << 20)))

    if Fp == F and F <= max_collapse_features:
        out = _pallas_linear_collapsed(
            x, wt, b2, out_dtype=out_dtype, compute_dtype=compute_dtype,
            budget=budget, vmem_limit=vmem_limit)
    else:
        out = _pallas_linear_kpath(
            x, wt, b2, out_dtype=out_dtype, compute_dtype=compute_dtype,
            tk=tk, budget=budget, vmem_limit=vmem_limit)
    return out[:, :n_out] if n_out != Op else out


if __name__ == "__main__":
    key = jax.random.PRNGKey(0)
    kx, kw, kx2, kw2, kx3, kw3 = jax.random.split(key, 6)

    # --- 1) small shapes implied by the module: x [batch, n_feat] -> [batch, n_out]
    batch, n_feat, n_out = 8, 32, 16
    x = jax.random.normal(kx, (batch, n_feat), dtype=jnp.float32)
    weight, bias = init_params(kw, n_feat, n_out)
    wt, b2 = prepare_params(weight, bias)            # hoisted, done once

    fwd = jax.jit(functools.partial(softmax_model_forward, n_out=n_out,
                                    force_pallas=True))
    y = fwd(x, wt, b2)
    jax.block_until_ready(y)
    y_ref = x @ weight.T + bias
    assert y.shape == (batch, n_out)
    assert jnp.allclose(y, y_ref, atol=1e-5, rtol=1e-5)

    # small-shape dispatch path (plain XLA dot)
    y_small = softmax_model_forward(x, wt, b2, n_out=n_out)
    assert jnp.allclose(y_small, y_ref, atol=1e-5, rtol=1e-5)

    # --- 2) multi-batch-tile collapsed path (megacore-friendly: >=2 batch tiles)
    b_, f_, o_ = 256, 256, 10
    x2 = jax.random.normal(kx2, (b_, f_), dtype=jnp.float32)
    w2, bias2 = init_params(kw2, f_, o_)
    wt2, bb2 = prepare_params(w2, bias2)
    y2 = jax.jit(functools.partial(softmax_model_forward, n_out=o_,
                                   force_pallas=True))(x2, wt2, bb2)
    jax.block_until_ready(y2)
    assert jnp.allclose(y2, x2 @ w2.T + bias2, atol=1e-4, rtol=1e-4)

    # --- 3) K-split path (f32 accumulate-into-output kernel), forced via small
    #        collapse threshold so it runs at test-friendly shapes.
    b3, f3, o3 = 64, 512, 24
    x3 = jax.random.normal(kx3, (b3, f3), dtype=jnp.float32)
    w3, bias3 = init_params(kw3, f3, o3)
    wt3, bb3 = prepare_params(w3, bias3, max_collapse_features=256, tk=256)
    kfwd = jax.jit(functools.partial(softmax_model_forward, n_out=o3,
                                     force_pallas=True,
                                     max_collapse_features=256, tk=256))
    y3 = kfwd(x3, wt3, bb3)
    jax.block_until_ready(y3)
    assert jnp.allclose(y3, x3 @ w3.T + bias3, atol=1e-4, rtol=1e-4)

    # --- 4) K-split path with bf16 activations (f32-scratch accumulator kernel)
    x3b = x3.astype(jnp.bfloat16)
    y3b = kfwd(x3b, wt3, bb3)
    jax.block_until_ready(y3b)
    ref3b = x3b.astype(jnp.float32) @ w3.T + bias3
    assert jnp.allclose(y3b.astype(jnp.float32), ref3b, atol=5e-2, rtol=5e-2)

    print("KERNEL_OK")
</pallas_src>

<mosaic_0001>
module attributes {stable_mosaic.version = 11 : i64} {
  func.func @_linear_kernel_collapsed(%arg0: i32, %arg1: i32, %arg2: memref<8x32xf32, #tpu.memory_space<vmem>>, %arg3: memref<32x128xf32, #tpu.memory_space<vmem>>, %arg4: memref<1x128xf32, #tpu.memory_space<vmem>>, %arg5: memref<8x128xf32, #tpu.memory_space<vmem>>) attributes {dimension_semantics = [#tpu.dimension_semantics<parallel>, #tpu.dimension_semantics<parallel>], iteration_bounds = array<i64: 1, 1>, scalar_prefetch = 0 : i64, scratch_operands = 0 : i64, tpu.core_type = #tpu.core_type<tc>, window_params = [{transform_indices = @transform_0, window_bounds = array<i64: 8, 32>}, {transform_indices = @transform_1, window_bounds = array<i64: 32, 128>}, {transform_indices = @transform_2, window_bounds = array<i64: 1, 128>}, {transform_indices = @transform_3, window_bounds = array<i64: 8, 128>}]} {
    %c0 = arith.constant 0 : index
    %c0_0 = arith.constant 0 : index
    %0 = vector.load %arg2[%c0, %c0_0] : memref<8x32xf32, #tpu.memory_space<vmem>>, vector<8x32xf32>
    %c0_1 = arith.constant 0 : index
    %c0_2 = arith.constant 0 : index
    %1 = vector.load %arg3[%c0_1, %c0_2] : memref<32x128xf32, #tpu.memory_space<vmem>>, vector<32x128xf32>
    %cst = arith.constant dense<0.000000e+00> : vector<8x128xf32>
    %2 = tpu.matmul %0, %1, %cst {dimension_numbers = #tpu.dot_dimension_numbers<[1], [0], [0], [1], [0, 0, 1, 1], [], []>} : vector<8x32xf32>, vector<32x128xf32>, vector<8x128xf32> -> vector<8x128xf32>
    %c0_3 = arith.constant 0 : index
    %c0_4 = arith.constant 0 : index
    %3 = vector.load %arg4[%c0_3, %c0_4] : memref<1x128xf32, #tpu.memory_space<vmem>>, vector<1x128xf32>
    %4 = vector.broadcast %3 : vector<1x128xf32> to vector<8x128xf32>
    %5 = arith.addf %2, %4 : vector<8x128xf32>
    %c0_5 = arith.constant 0 : index
    %c0_6 = arith.constant 0 : index
    %6 = vector.load %arg5[%c0_5, %c0_6] : memref<8x128xf32, #tpu.memory_space<vmem>>, vector<8x128xf32>
    tpu.vector_store %arg5[%c0_5, %c0_6], %5 {strides = array<i32>} : memref<8x128xf32, #tpu.memory_space<vmem>>, vector<8x128xf32>,
    return
  }
  func.func @transform_0(%arg0: i32, %arg1: i32) -> (i32, i32) {
    %c0_i32 = arith.constant 0 : i32
    %c0_i32_0 = arith.constant 0 : i32
    return %arg1, %c0_i32 : i32, i32
  }
  func.func @transform_1(%arg0: i32, %arg1: i32) -> (i32, i32) {
    %c0_i32 = arith.constant 0 : i32
    %c0_i32_0 = arith.constant 0 : i32
    return %c0_i32, %arg0 : i32, i32
  }
  func.func @transform_2(%arg0: i32, %arg1: i32) -> (i32, i32) {
    %c0_i32 = arith.constant 0 : i32
    %c0_i32_0 = arith.constant 0 : i32
    return %c0_i32, %arg0 : i32, i32
  }
  func.func @transform_3(%arg0: i32, %arg1: i32) -> (i32, i32) {
    %c0_i32 = arith.constant 0 : i32
    return %arg1, %arg0 : i32, i32
  }
}

</mosaic_0001>

<bundles_post_ra>
// kernel: softmax_model_forward.1
= control target key start
LH: loop header
LB: loop body
LE: loop exit
PB: predicated region body
PF: predicated region fallthrough
CT: control target
= control target key end

     0   :  { %8 = vsyncpa [#allocation3], 0  ;;  %s322_s0 = inlined_call_operand.hbm [shape: f32[8,32], index: 0, kind: input, shape index: {}]   ;;  %s323_s1 = inlined_call_operand.hbm [shape: f32[32,128], index: 1, kind: input, shape index: {}]   ;;  %s324_s2 = inlined_call_operand.vmem [shape: f32[1,128], index: 2, kind: input, shape index: {}]   ;;  %s325_s3 = inlined_call_operand.hbm [shape: f32[8,128], index: 3, kind: output, shape index: {}]  }
   0x1   :  { %9 = vsyncpa [#allocation6], 0 }
   0x2   :  { %10 = vsyncpa [#allocation4], 0  ;;  %s248_s12 = smov [#allocation2]   ;;  %s249_s14 = smov [#allocation5]  }
   0x3   :  { %s17_s13 = sshll.u32 %s248_s12, 4  ;;  %s26_s15 = sshll.u32 %s249_s14, 4  ;;  %s18_s13 = int_to_ptr.vmem [resolvable:$true] %s17_s13  ;;  %s276_s15 = int_to_ptr.vmem [resolvable:$true] %s26_s15 }
   0x4   :  { %s176_s18 = scalar_lea.hbm %s322_s0, 128 }
   0x5   :  { %p177_p0 = scmp.ne.s32.totalorder %s322_s0, %s176_s18  ;;  %p180_p1 = scmp.lt.u32.totalorder %s176_s18, %s322_s0 }
   0x7   :  { %p182_p2 = pnand %p180_p1, %p177_p0 }
   0x9   :  { %185 = shalt.err (!%p182_p2)
}
   0xa   :  { %s186_s23 = scalar_lea.vmem %s18_s13, 128  ;;  %p191_p4 = scmp.lt.s32.totalorder %s18_s13, %s18_s13 }
   0xb   :  { %p187_p3 = scmp.ne.s32.totalorder %s18_s13, %s186_s23  ;;  %p192_p5 = scmp.lt.s32.totalorder %s186_s23, %s186_s23 }
   0xd   :  { %p193_p6 = por %p192_p5, %p191_p4 }
   0xf   :  { %p194_p7 = pnand %p193_p6, %p187_p3 }
  0x11   :  { %197 = shalt.err (!%p194_p7)
}
  0x12   :  { %20 = dma.hbm_to_vmem [thread:$0]  %s322_s0, 128, %s18_s13, [#allocation3]  }
  0x13   :  { %s198_s28 = scalar_lea.hbm %s323_s1, 512 }
  0x14   :  { %p199_p8 = scmp.ne.s32.totalorder %s323_s1, %s198_s28  ;;  %p202_p9 = scmp.lt.u32.totalorder %s198_s28, %s323_s1 }
  0x16   :  { %p204_p10 = pnand %p202_p9, %p199_p8 }
  0x18   :  { %207 = shalt.err (!%p204_p10)
}
  0x19   :  { %s208_s6 = scalar_lea.vmem %s276_s15, 512  ;;  %p213_p12 = scmp.lt.s32.totalorder %s276_s15, %s276_s15 }
  0x1a   :  { %p209_p11 = scmp.ne.s32.totalorder %s276_s15, %s208_s6  ;;  %p214_p13 = scmp.lt.s32.totalorder %s208_s6, %s208_s6 }
  0x1c   :  { %p215_p0 = por %p214_p13, %p213_p12 }
  0x1e   :  { %p216_p1 = pnand %p215_p0, %p209_p11 }
  0x20   :  { %219 = shalt.err (!%p216_p1)
}
  0x21   :  { %s250_s0 = smov 128   ;;  %s251_s7 = smov 8  }
  0x22   :  { %32 = dma.hbm_to_vmem [thread:$0]  %s323_s1, 512, %s276_s15, [#allocation6], %s250_s0, %s250_s0, %s251_s7  }
  0x23   :  { %242 = dma.done.wait [#allocation3], 128  }
  0x24   :  { %243 = vsyncadd [#allocation3], 4294967168 }
  0x25   :  { %244 = dma.done.wait [#allocation6], 512  }
  0x26   :  { %245 = vsyncadd [#allocation6], 4294966784  ;;  %v252_v0 = vmov 0.0|0.0   ;;  %vm253_vm0 = vmmov 0   ;;  %v254_v1 = vmov 0.0   ;;  %v42_v2 = vld [vmem:[#allocation5] sm:$0xff] }
  0x27   :  { %162 = vmatprep.subr.bf16.mxu0 %v252_v0  ;;  %159 = vmatprep.mubr.msk.f32.mxu0 %vm253_vm0, %v254_v1  ;;  %v43_v3 = vld [vmem:[#allocation5 + $0x8] sm:$0xff]  ;;  %v44_v4 = vld [vmem:[#allocation5 + $0x10] sm:$0xff]  ;;  %v45_v6 = vld [vmem:[#allocation5 + $0x18] sm:$0xff]  ;;  %vm53_vm1 = vcmask 261120   ;;  %s255_s11 = smov [#allocation7]  }
  0x28   :  { %v163_v5 = vpack.c.bf16 %v43_v3, %v42_v2  ;;  %v166_v7 = vpack.c.bf16 %v45_v6, %v44_v4  ;;  %v41_v8 = vld [vmem:[#allocation2] sm:$0xff]  ;;  %s134_s12 = sshll.u32 %s255_s11, 4  ;;  %s135_s12 = int_to_ptr.vmem [resolvable:$true] %s134_s12 }
  0x29   :  { %v144_v9 = vld [vmem:[%s324_s2] ss:$0 sm:$0xff]  ;;  %s220_s13 = scalar_lea.vmem %s135_s12, 128  ;;  %p225_p3 = scmp.lt.s32.totalorder %s135_s12, %s135_s12 }
  0x2a   :  { %164 = vmatpush3.bf16.msra.mxu0 %v163_v5  ;;  %p221_p2 = scmp.ne.s32.totalorder %s135_s12, %s220_s13  ;;  %p226_p4 = scmp.lt.s32.totalorder %s220_s13, %s220_s13 }
  0x2b   :  { %165 = vmatprep.subr.bf16.mxu0 %v252_v0 }
  0x2c   :  { %p227_p5 = por %p226_p4, %p225_p3 }
  0x2e   :  { %167 = vmatpush3.bf16.msra.mxu0 %v166_v7  ;;  %p228_p6 = pnand %p227_p5, %p221_p2 }
  0x31   :  { %160 = vmatmul.mubr.msk.f32.vlgmr.msra.gmra.mrb[0].mxu0 %vm53_vm1, %v41_v8 }
 0x104   :  { %v123_v10 = vpop.f32.mrb[0].mxu0 }
 0x105   :  { %v124_v11 = vadd.f32 %v144_v9, %v123_v10  ;;  %v161_v12 = vpop.f32.mrb[1].mxu0 }
 0x107   :  { %127 = vst [vmem:[#allocation7] sm:$0xff] %v124_v11 }
 0x108   :  { %231 = shalt.err (!%p228_p6)
}
 0x109   :  { %s232_s16 = scalar_lea.hbm %s325_s3, 128 }
 0x10a   :  { %p233_p7 = scmp.ne.s32.totalorder %s325_s3, %s232_s16  ;;  %p236_p8 = scmp.lt.u32.totalorder %s232_s16, %s325_s3 }
 0x10c   :  { %p238_p9 = pnand %p236_p8, %p233_p7 }
 0x10e   :  { %241 = shalt.err (!%p238_p9)
}
 0x10f   :  { %137 = dma.vmem_to_hbm [thread:$0]  %s135_s12, 128, %s325_s3, [#allocation4]  }
 0x110   :  { %246 = dma.done.wait [#allocation4], 128  }
 0x111   :  { %247 = vsyncadd [#allocation4], 4294967168 }
 0x112   :  { %141 = vsyncpa [#allocation3], 1 }
 0x113   :  { %142 = vsyncpa [#allocation6], 1 }
 0x114   :  { %143 = vsyncpa [#allocation4], 1 }

</bundles_post_ra>
